<compile_context>
chip_gen: v5e
topology: v5e:2x2
jax: 0.10.0
libtpu: 0.0.40
codegen_flags: <defaults>
</compile_context>

<pallas_src>
import functools
import math

import jax
import jax.numpy as jnp
from jax import lax
from jax.experimental import pallas as pl
from jax.experimental.pallas import tpu as pltpu

LRELU_SLOPE = 0.1
_HALO = 128          # halo columns per side -> lane-aligned window stitch


def get_padding(kernel_size, dilation=1):
    return int((kernel_size * dilation - dilation) / 2)


def _round_up(x, m):
    return ((x + m - 1) // m) * m


def _choose_time_tile(t, c, b, itemsize, target_bytes=1 << 20, min_tile=128):
    """~target_bytes per main tile (mem-bound -> big DMAs), multiple of 128
    lanes; shrink only if the grid would be too small for v7x's 2 TCs."""
    tt = max(min_tile, (target_bytes // (itemsize * c)) // 128 * 128)
    tt = min(tt, _round_up(t, 128))
    while b * math.ceil(t / tt) < 4 and tt > min_tile:   # keep >=4 grid steps
        tt = max(min_tile, (tt // 2) // 128 * 128)
    return tt, _round_up(t, tt)


def _resblock2_kernel(x_ref, hl_ref, hr_ref, w1_ref, b1_ref, w2_ref, b2_ref,
                      o_ref, xw_ref, *, t_tile, t_total, kernel_size,
                      d1, d2, pad1, pad2, fuse_taps):
    """Fused ResBlock2 for one (batch, time-tile) grid point.  NCT layout:
    channels on sublanes, time on lanes.

    x_ref  : (1, C, TT)           main activation tile
    hl_ref : (1, 1, C, HALO)      left halo columns (zeros at sequence start)
    hr_ref : (1, 1, C, HALO)      right halo columns (zeros at sequence end)
    w*_ref : (C, K*C)             tap-major (c_out, k*C + c_in) weights
    b*_ref : (C, 1)               biases (f32)
    o_ref  : (1, C, TT)           output tile
    xw_ref : (C, TT + 2*HALO)     VMEM scratch: haloed time window
    """
    TT = t_tile
    K = kernel_size
    C = o_ref.shape[1]
    H = _HALO
    n1 = TT + 2 * pad2                       # conv1 columns needed by conv2

    # ---- haloed time window in VMEM (all three stores lane-aligned) --------
    xw_ref[:, 0:H] = hl_ref[0, 0]
    xw_ref[:, H:H + TT] = x_ref[0]
    xw_ref[:, H + TT:] = hr_ref[0, 0]
    xw = xw_ref[...]                                          # (C, TT + 2H)
    xa = jnp.where(xw > 0, xw, LRELU_SLOPE * xw).astype(w1_ref.dtype)

    def dilated_conv(xact, w_ref, dil, base, n):
        """out[:, j] = sum_k W_k @ xact[:, base + k*dil + j]  (f32 accumulate)."""
        if fuse_taps:
            # Single wide-contraction MXU matmul: (C, K*C) @ (K*C, n).
            xcat = jnp.concatenate(
                [xact[:, base + k * dil:base + k * dil + n] for k in range(K)],
                axis=0)
            return jnp.dot(w_ref[...], xcat, preferred_element_type=jnp.float32)
        acc = jnp.zeros((C, n), jnp.float32)
        for k in range(K):
            acc = acc + jnp.dot(w_ref[:, k * C:(k + 1) * C],
                                xact[:, base + k * dil:base + k * dil + n],
                                preferred_element_type=jnp.float32)
        return acc

    # ---- conv1 (dilation d1) + bias + residual on the extended window ------
    base1 = H - pad2 - pad1
    y1 = dilated_conv(xa, w1_ref, d1, base1, n1)
    y1 = y1 + b1_ref[...] + xw[:, H - pad2:H - pad2 + n1].astype(jnp.float32)

    # Columns outside the true sequence [0, T) act as conv2's "same" zero
    # padding at the global edges (and kill tail-padding garbage).  Kept
    # unconditional: it is a single VPU select with plenty of slack, and the
    # y1 scratch needed to pl.when-gate it would cost more (review item 10).
    col = lax.broadcasted_iota(jnp.int32, (1, n1), 1)
    gpos = pl.program_id(1) * TT - pad2 + col
    y1 = jnp.where((gpos >= 0) & (gpos < t_total), y1, 0.0)

    # ---- conv2 (dilation d2) + bias + residual on the central TT columns ---
    ya = jnp.where(y1 > 0, y1, LRELU_SLOPE * y1).astype(w2_ref.dtype)
    y2 = dilated_conv(ya, w2_ref, d2, 0, TT)
    y2 = y2 + b2_ref[...] + y1[:, pad2:pad2 + TT]
    o_ref[0] = y2.astype(o_ref.dtype)


def resblock2_forward(x_nct, weights_oik, biases, *, kernel_size=3,
                      dilation=(1, 3), compute_dtype=None, fuse_taps=None,
                      time_tile_bytes=1 << 20):
    """Pallas implementation of ResBlock2.forward.

    x_nct        : (B, C, T) in PyTorch's NCT Conv1d layout (kept end-to-end).
    weights_oik  : two (C_out, C_in, K) conv weights (weight_norm folded in).
    biases       : two (C,) conv biases.
    compute_dtype: matmul input/weight dtype; default bf16 when x is f32
                   (f32 accumulation and f32 residual path are kept).
    fuse_taps    : fuse the K taps into one wide matmul (default: C <= 256).
    """
    B, C, T = x_nct.shape
    K = kernel_size
    d1, d2 = dilation
    pad1 = get_padding(K, d1)
    pad2 = get_padding(K, d2)
    H = _HALO
    assert pad1 + pad2 <= H, "halo too small for this kernel_size/dilation"

    if compute_dtype is None:
        compute_dtype = jnp.bfloat16 if x_nct.dtype == jnp.float32 else x_nct.dtype
    if fuse_taps is None:
        fuse_taps = C <= 256

    itemsize = jnp.dtype(x_nct.dtype).itemsize
    TT, Tp = _choose_time_tile(T, C, B, itemsize, target_bytes=time_tile_bytes)
    nT = Tp // TT

    x = x_nct
    if Tp != T:                              # tail padding (masked in-kernel)
        x = jnp.pad(x, ((0, 0), (0, 0), (0, Tp - T)))

    # Per-tile halo slabs (H time columns per side); zero slabs at the global
    # sequence edges realize the convs' zero "same" padding.
    xr = x.reshape(B, C, nT, TT)
    zeros = jnp.zeros((B, 1, C, H), x.dtype)
    if nT > 1:
        tails = jnp.transpose(xr[:, :, :-1, TT - H:], (0, 2, 1, 3))  # prev tile tail
        heads = jnp.transpose(xr[:, :, 1:, :H], (0, 2, 1, 3))        # next tile head
        halo_l = jnp.concatenate([zeros, tails], axis=1)             # (B, nT, C, H)
        halo_r = jnp.concatenate([heads, zeros], axis=1)
    else:
        halo_l = zeros
        halo_r = zeros

    # (O, I, K) -> (O, K, I) -> (O, K*I): tap-major columns so the kernel can
    # use one wide-contraction matmul or aligned per-tap sub-slices.
    w1 = jnp.transpose(weights_oik[0], (0, 2, 1)).reshape(C, K * C).astype(compute_dtype)
    w2 = jnp.transpose(weights_oik[1], (0, 2, 1)).reshape(C, K * C).astype(compute_dtype)
    b1 = biases[0].astype(jnp.float32).reshape(C, 1)
    b2 = biases[1].astype(jnp.float32).reshape(C, 1)

    kernel = functools.partial(
        _resblock2_kernel, t_tile=TT, t_total=T, kernel_size=K,
        d1=d1, d2=d2, pad1=pad1, pad2=pad2, fuse_taps=fuse_taps)

    out = pl.pallas_call(
        kernel,
        out_shape=jax.ShapeDtypeStruct((B, C, Tp), x.dtype),
        grid_spec=pltpu.PrefetchScalarGridSpec(
            num_scalar_prefetch=0,
            grid=(B, nT),
            in_specs=[
                pl.BlockSpec((1, C, TT), lambda b, i: (b, 0, i)),        # x tile
                pl.BlockSpec((1, 1, C, H), lambda b, i: (b, i, 0, 0)),   # left halo
                pl.BlockSpec((1, 1, C, H), lambda b, i: (b, i, 0, 0)),   # right halo
                pl.BlockSpec((C, K * C), lambda b, i: (0, 0)),           # w1 (resident)
                pl.BlockSpec((C, 1), lambda b, i: (0, 0)),               # b1
                pl.BlockSpec((C, K * C), lambda b, i: (0, 0)),           # w2 (resident)
                pl.BlockSpec((C, 1), lambda b, i: (0, 0)),               # b2
            ],
            out_specs=pl.BlockSpec((1, C, TT), lambda b, i: (b, 0, i)),
            scratch_shapes=[pltpu.VMEM((C, TT + 2 * H), x.dtype)],       # haloed window
        ),
        compiler_params=pltpu.CompilerParams(
            dimension_semantics=("parallel", "parallel"),
            vmem_limit_bytes=48 * 1024 * 1024),   # explicit budget; safe on v5e/v6e/v7x
    )(x, halo_l, halo_r, w1, b1, w2, b2)

    if Tp != T:
        out = out[:, :, :T]
    return out


def resblock2_reference(x_nct, weights_oik, biases, *, kernel_size=3,
                        dilation=(1, 3)):
    """Pure-JAX reference mirroring the PyTorch forward (for verification)."""
    x = x_nct
    for w, b, d in zip(weights_oik, biases, dilation):
        pad = get_padding(kernel_size, d)
        xt = jnp.where(x > 0, x, LRELU_SLOPE * x)
        xt = lax.conv_general_dilated(
            xt, w, window_strides=(1,), padding=[(pad, pad)],
            rhs_dilation=(d,), dimension_numbers=("NCH", "OIH", "NCH"))
        xt = xt + b.reshape(1, -1, 1)
        x = xt + x
    return x


if __name__ == "__main__":
    K = 3
    dilation = (1, 3)

    def make_case(key, B, C, T):
        kx, kw0, kw1, kb0, kb1 = jax.random.split(key, 5)
        x = jax.random.normal(kx, (B, C, T), dtype=jnp.float32)
        # init_weights in HiFi-GAN: normal(0, 0.01); weight_norm is identity at
        # init, so plain weights suffice for this synthetic module.
        weights = [0.01 * jax.random.normal(kw0, (C, C, K), dtype=jnp.float32),
                   0.01 * jax.random.normal(kw1, (C, C, K), dtype=jnp.float32)]
        biases = [0.01 * jax.random.normal(kb0, (C,), dtype=jnp.float32),
                  0.01 * jax.random.normal(kb1, (C,), dtype=jnp.float32)]
        return x, weights, biases

    def check(key, B, C, T, *, compute_dtype, fuse_taps=None, atol, rtol):
        x, w, b = make_case(key, B, C, T)
        out = resblock2_forward(x, w, b, kernel_size=K, dilation=dilation,
                                compute_dtype=compute_dtype, fuse_taps=fuse_taps)
        out = jax.block_until_ready(out)
        ref = resblock2_reference(x, w, b, kernel_size=K, dilation=dilation)
        assert out.shape == (B, C, T)
        assert jnp.allclose(out, ref, atol=atol, rtol=rtol), (
            f"mismatch vs reference (B={B}, C={C}, T={T}, "
            f"cdt={compute_dtype}, fuse={fuse_taps})")

    key = jax.random.PRNGKey(0)
    k1, k2, k3, k4, k5 = jax.random.split(key, 5)
    # Exact (f32-compute) checks:
    check(k1, 2, 16, 256, compute_dtype=jnp.float32, atol=2e-5, rtol=2e-5)   # multi-tile
    check(k2, 1, 32, 200, compute_dtype=jnp.float32, atol=2e-5, rtol=2e-5)   # tail pad + mask
    check(k3, 1, 128, 512, compute_dtype=jnp.float32, atol=2e-5, rtol=2e-5)  # larger C, fused
    check(k4, 2, 16, 256, compute_dtype=jnp.float32, fuse_taps=False,
          atol=2e-5, rtol=2e-5)                                              # per-tap path
    # Default bf16 matmul inputs (v6e/v7x MXU); accumulation/residual stay f32.
    check(k5, 2, 16, 256, compute_dtype=None, atol=1e-2, rtol=1e-2)

    print("KERNEL_OK")
</pallas_src>

<mosaic_0001>
module attributes {stable_mosaic.version = 11 : i64} {
  func.func @_resblock2_kernel(%arg0: i32, %arg1: i32, %arg2: memref<1x16x128xf32, #tpu.memory_space<vmem>>, %arg3: memref<1x1x16x128xf32, #tpu.memory_space<vmem>>, %arg4: memref<1x1x16x128xf32, #tpu.memory_space<vmem>>, %arg5: memref<16x48xf32, #tpu.memory_space<vmem>>, %arg6: memref<16x1xf32, #tpu.memory_space<vmem>>, %arg7: memref<16x48xf32, #tpu.memory_space<vmem>>, %arg8: memref<16x1xf32, #tpu.memory_space<vmem>>, %arg9: memref<1x16x128xf32, #tpu.memory_space<vmem>>, %arg10: memref<16x384xf32, #tpu.memory_space<vmem>>) attributes {dimension_semantics = [#tpu.dimension_semantics<parallel>, #tpu.dimension_semantics<parallel>], iteration_bounds = array<i64: 2, 2>, scalar_prefetch = 0 : i64, scratch_operands = 1 : i64, tpu.core_type = #tpu.core_type<tc>, window_params = [{transform_indices = @transform_0, window_bounds = array<i64: 1, 16, 128>}, {transform_indices = @transform_1, window_bounds = array<i64: 1, 1, 16, 128>}, {transform_indices = @transform_2, window_bounds = array<i64: 1, 1, 16, 128>}, {pipeline_mode = #tpu.pipeline_mode<synchronous>, transform_indices = @transform_3, window_bounds = array<i64: 16, 48>}, {pipeline_mode = #tpu.pipeline_mode<synchronous>, transform_indices = @transform_4, window_bounds = array<i64: 16, 1>}, {pipeline_mode = #tpu.pipeline_mode<synchronous>, transform_indices = @transform_5, window_bounds = array<i64: 16, 48>}, {pipeline_mode = #tpu.pipeline_mode<synchronous>, transform_indices = @transform_6, window_bounds = array<i64: 16, 1>}, {transform_indices = @transform_7, window_bounds = array<i64: 1, 16, 128>}]} {
    %c0 = arith.constant 0 : index
    %c0_0 = arith.constant 0 : index
    %c0_1 = arith.constant 0 : index
    %c0_2 = arith.constant 0 : index
    %0 = vector.load %arg3[%c0, %c0_0, %c0_1, %c0_2] : memref<1x1x16x128xf32, #tpu.memory_space<vmem>>, vector<1x1x16x128xf32>
    %1 = vector.shape_cast %0 : vector<1x1x16x128xf32> to vector<16x128xf32>
    %c0_3 = arith.constant 0 : index
    %c0_4 = arith.constant 0 : index
    %2 = vector.load %arg10[%c0_3, %c0_4] : memref<16x384xf32, #tpu.memory_space<vmem>>, vector<16x128xf32>
    tpu.vector_store %arg10[%c0_3, %c0_4], %1 {strides = array<i32>} : memref<16x384xf32, #tpu.memory_space<vmem>>, vector<16x128xf32>,
    %c0_5 = arith.constant 0 : index
    %c0_6 = arith.constant 0 : index
    %c0_7 = arith.constant 0 : index
    %3 = vector.load %arg2[%c0_5, %c0_6, %c0_7] : memref<1x16x128xf32, #tpu.memory_space<vmem>>, vector<1x16x128xf32>
    %4 = vector.shape_cast %3 : vector<1x16x128xf32> to vector<16x128xf32>
    %c0_8 = arith.constant 0 : index
    %c128 = arith.constant 128 : index
    %5 = vector.load %arg10[%c0_8, %c128] : memref<16x384xf32, #tpu.memory_space<vmem>>, vector<16x128xf32>
    tpu.vector_store %arg10[%c0_8, %c128], %4 {strides = array<i32>} : memref<16x384xf32, #tpu.memory_space<vmem>>, vector<16x128xf32>,
    %c0_9 = arith.constant 0 : index
    %c0_10 = arith.constant 0 : index
    %c0_11 = arith.constant 0 : index
    %c0_12 = arith.constant 0 : index
    %6 = vector.load %arg4[%c0_9, %c0_10, %c0_11, %c0_12] : memref<1x1x16x128xf32, #tpu.memory_space<vmem>>, vector<1x1x16x128xf32>
    %7 = vector.shape_cast %6 : vector<1x1x16x128xf32> to vector<16x128xf32>
    %c0_13 = arith.constant 0 : index
    %c256 = arith.constant 256 : index
    %8 = vector.load %arg10[%c0_13, %c256] : memref<16x384xf32, #tpu.memory_space<vmem>>, vector<16x128xf32>
    tpu.vector_store %arg10[%c0_13, %c256], %7 {strides = array<i32>} : memref<16x384xf32, #tpu.memory_space<vmem>>, vector<16x128xf32>,
    %c0_14 = arith.constant 0 : index
    %c0_15 = arith.constant 0 : index
    %9 = vector.load %arg10[%c0_14, %c0_15] : memref<16x384xf32, #tpu.memory_space<vmem>>, vector<16x384xf32>
    %cst = arith.constant 0.000000e+00 : f32
    %10 = vector.broadcast %cst : f32 to vector<16x384xf32>
    %11 = arith.cmpf ogt, %9, %10 : vector<16x384xf32>
    %cst_16 = arith.constant 1.000000e-01 : f32
    %12 = vector.broadcast %cst_16 : f32 to vector<16x384xf32>
    %13 = arith.mulf %12, %9 : vector<16x384xf32>
    %14 = arith.select %11, %9, %13 : vector<16x384xi1>, vector<16x384xf32>
    %15 = vector.extract_strided_slice %14 {offsets = [0, 124], sizes = [16, 134], strides = [1, 1]} : vector<16x384xf32> to vector<16x134xf32>
    %16 = vector.extract_strided_slice %14 {offsets = [0, 125], sizes = [16, 134], strides = [1, 1]} : vector<16x384xf32> to vector<16x134xf32>
    %17 = vector.extract_strided_slice %14 {offsets = [0, 126], sizes = [16, 134], strides = [1, 1]} : vector<16x384xf32> to vector<16x134xf32>
    %18 = tpu.concatenate %15, %16, %17 in 0 : vector<16x134xf32>, vector<16x134xf32>, vector<16x134xf32> -> vector<48x134xf32>
    %c0_17 = arith.constant 0 : index
    %c0_18 = arith.constant 0 : index
    %19 = vector.load %arg5[%c0_17, %c0_18] : memref<16x48xf32, #tpu.memory_space<vmem>>, vector<16x48xf32>
    %cst_19 = arith.constant dense<0.000000e+00> : vector<16x134xf32>
    %20 = tpu.matmul %19, %18, %cst_19 {dimension_numbers = #tpu.dot_dimension_numbers<[1], [0], [0], [1], [0, 0, 1, 1], [], []>} : vector<16x48xf32>, vector<48x134xf32>, vector<16x134xf32> -> vector<16x134xf32>
    %c0_20 = arith.constant 0 : index
    %c0_21 = arith.constant 0 : index
    %21 = vector.load %arg6[%c0_20, %c0_21] : memref<16x1xf32, #tpu.memory_space<vmem>>, vector<16x1xf32>
    %22 = vector.broadcast %21 : vector<16x1xf32> to vector<16x134xf32>
    %23 = arith.addf %20, %22 : vector<16x134xf32>
    %24 = vector.extract_strided_slice %9 {offsets = [0, 125], sizes = [16, 134], strides = [1, 1]} : vector<16x384xf32> to vector<16x134xf32>
    %25 = arith.addf %23, %24 : vector<16x134xf32>
    %26 = tpu.iota {dimensions = array<i32: 1>} : vector<1x134xi32>
    %c128_i32 = arith.constant 128 : i32
    %27 = arith.muli %arg1, %c128_i32 : i32
    %c3_i32 = arith.constant 3 : i32
    %28 = arith.subi %27, %c3_i32 : i32
    %29 = vector.broadcast %28 : i32 to vector<1x134xi32>
    %30 = arith.addi %29, %26 : vector<1x134xi32>
    %c0_i32 = arith.constant 0 : i32
    %31 = vector.broadcast %c0_i32 : i32 to vector<1x134xi32>
    %32 = arith.cmpi sge, %30, %31 : vector<1x134xi32>
    %c256_i32 = arith.constant 256 : i32
    %33 = vector.broadcast %c256_i32 : i32 to vector<1x134xi32>
    %34 = arith.cmpi slt, %30, %33 : vector<1x134xi32>
    %35 = arith.andi %32, %34 : vector<1x134xi1>
    %cst_22 = arith.constant 0.000000e+00 : f32
    %36 = vector.shape_cast %35 : vector<1x134xi1> to vector<1x134xi1>
    %37 = vector.broadcast %36 : vector<1x134xi1> to vector<16x134xi1>
    %38 = vector.broadcast %cst_22 : f32 to vector<16x134xf32>
    %39 = arith.select %37, %25, %38 : vector<16x134xi1>, vector<16x134xf32>
    %cst_23 = arith.constant 0.000000e+00 : f32
    %40 = vector.broadcast %cst_23 : f32 to vector<16x134xf32>
    %41 = arith.cmpf ogt, %39, %40 : vector<16x134xf32>
    %cst_24 = arith.constant 1.000000e-01 : f32
    %42 = vector.broadcast %cst_24 : f32 to vector<16x134xf32>
    %43 = arith.mulf %42, %39 : vector<16x134xf32>
    %44 = arith.select %41, %39, %43 : vector<16x134xi1>, vector<16x134xf32>
    %45 = vector.extract_strided_slice %44 {offsets = [0, 0], sizes = [16, 128], strides = [1, 1]} : vector<16x134xf32> to vector<16x128xf32>
    %46 = vector.extract_strided_slice %44 {offsets = [0, 3], sizes = [16, 128], strides = [1, 1]} : vector<16x134xf32> to vector<16x128xf32>
    %47 = vector.extract_strided_slice %44 {offsets = [0, 6], sizes = [16, 128], strides = [1, 1]} : vector<16x134xf32> to vector<16x128xf32>
    %48 = tpu.concatenate %45, %46, %47 in 0 : vector<16x128xf32>, vector<16x128xf32>, vector<16x128xf32> -> vector<48x128xf32>
    %c0_25 = arith.constant 0 : index
    %c0_26 = arith.constant 0 : index
    %49 = vector.load %arg7[%c0_25, %c0_26] : memref<16x48xf32, #tpu.memory_space<vmem>>, vector<16x48xf32>
    %cst_27 = arith.constant dense<0.000000e+00> : vector<16x128xf32>
    %50 = tpu.matmul %49, %48, %cst_27 {dimension_numbers = #tpu.dot_dimension_numbers<[1], [0], [0], [1], [0, 0, 1, 1], [], []>} : vector<16x48xf32>, vector<48x128xf32>, vector<16x128xf32> -> vector<16x128xf32>
    %c0_28 = arith.constant 0 : index
    %c0_29 = arith.constant 0 : index
    %51 = vector.load %arg8[%c0_28, %c0_29] : memref<16x1xf32, #tpu.memory_space<vmem>>, vector<16x1xf32>
    %52 = vector.broadcast %51 : vector<16x1xf32> to vector<16x128xf32>
    %53 = arith.addf %50, %52 : vector<16x128xf32>
    %54 = vector.extract_strided_slice %39 {offsets = [0, 3], sizes = [16, 128], strides = [1, 1]} : vector<16x134xf32> to vector<16x128xf32>
    %55 = arith.addf %53, %54 : vector<16x128xf32>
    %c0_30 = arith.constant 0 : index
    %c0_31 = arith.constant 0 : index
    %c0_32 = arith.constant 0 : index
    %56 = vector.load %arg9[%c0_30, %c0_31, %c0_32] : memref<1x16x128xf32, #tpu.memory_space<vmem>>, vector<1x16x128xf32>
    %57 = vector.shape_cast %56 : vector<1x16x128xf32> to vector<16x128xf32>
    %58 = vector.shape_cast %55 : vector<16x128xf32> to vector<1x16x128xf32>
    tpu.vector_store %arg9[%c0_30, %c0_31, %c0_32], %58 {strides = array<i32>} : memref<1x16x128xf32, #tpu.memory_space<vmem>>, vector<1x16x128xf32>,
    return
  }
  func.func @transform_0(%arg0: i32, %arg1: i32) -> (i32, i32, i32) {
    %c0_i32 = arith.constant 0 : i32
    %c0_i32_0 = arith.constant 0 : i32
    return %arg0, %c0_i32, %arg1 : i32, i32, i32
  }
  func.func @transform_1(%arg0: i32, %arg1: i32) -> (i32, i32, i32, i32) {
    %c0_i32 = arith.constant 0 : i32
    %c0_i32_0 = arith.constant 0 : i32
    %c0_i32_1 = arith.constant 0 : i32
    return %arg0, %arg1, %c0_i32, %c0_i32_0 : i32, i32, i32, i32
  }
  func.func @transform_2(%arg0: i32, %arg1: i32) -> (i32, i32, i32, i32) {
    %c0_i32 = arith.constant 0 : i32
    %c0_i32_0 = arith.constant 0 : i32
    %c0_i32_1 = arith.constant 0 : i32
    return %arg0, %arg1, %c0_i32, %c0_i32_0 : i32, i32, i32, i32
  }
  func.func @transform_3(%arg0: i32, %arg1: i32) -> (i32, i32) {
    %c0_i32 = arith.constant 0 : i32
    %c0_i32_0 = arith.constant 0 : i32
    %c0_i32_1 = arith.constant 0 : i32
    return %c0_i32, %c0_i32_0 : i32, i32
  }
  func.func @transform_4(%arg0: i32, %arg1: i32) -> (i32, i32) {
    %c0_i32 = arith.constant 0 : i32
    %c0_i32_0 = arith.constant 0 : i32
    %c0_i32_1 = arith.constant 0 : i32
    return %c0_i32, %c0_i32_0 : i32, i32
  }
  func.func @transform_5(%arg0: i32, %arg1: i32) -> (i32, i32) {
    %c0_i32 = arith.constant 0 : i32
    %c0_i32_0 = arith.constant 0 : i32
    %c0_i32_1 = arith.constant 0 : i32
    return %c0_i32, %c0_i32_0 : i32, i32
  }
  func.func @transform_6(%arg0: i32, %arg1: i32) -> (i32, i32) {
    %c0_i32 = arith.constant 0 : i32
    %c0_i32_0 = arith.constant 0 : i32
    %c0_i32_1 = arith.constant 0 : i32
    return %c0_i32, %c0_i32_0 : i32, i32
  }
  func.func @transform_7(%arg0: i32, %arg1: i32) -> (i32, i32, i32) {
    %c0_i32 = arith.constant 0 : i32
    %c0_i32_0 = arith.constant 0 : i32
    return %arg0, %c0_i32, %arg1 : i32, i32, i32
  }
}

</mosaic_0001>

<bundles_post_ra>
// kernel: tpu_custom_call.1
= control target key start
LH: loop header
LB: loop body
LE: loop exit
PB: predicated region body
PF: predicated region fallthrough
CT: control target
= control target key end

     0   :  { %s1732_s0 = inlined_call_operand.hbm [shape: f32[2,16,256], index: 0, kind: input, shape index: {}]   ;;  %s1733_s1 = inlined_call_operand.hbm [shape: f32[2,2,16,128], index: 1, kind: input, shape index: {}]   ;;  %s1734_s2 = inlined_call_operand.hbm [shape: f32[2,2,16,128], index: 2, kind: input, shape index: {}]   ;;  %s1735_s3 = inlined_call_operand.vmem [shape: f32[16,48], index: 3, kind: input, shape index: {}]   ;;  %s1736_s4 = inlined_call_operand.vmem [shape: f32[16,1], index: 4, kind: input, shape index: {}]   ;;  %s1737_s5 = inlined_call_operand.vmem [shape: f32[16,48], index: 5, kind: input, shape index: {}]   ;;  %s1738_s6 = inlined_call_operand.vmem [shape: f32[16,1], index: 6, kind: input, shape index: {}]   ;;  %s1739_s7 = inlined_call_operand.hbm [shape: f32[2,16,256], index: 7, kind: output, shape index: {}]  }
   0x1   :  { %1750 = sst [smem:[#allocation21_spill]] %s1733_s1 }
   0x2   :  { %1751 = sst [smem:[#allocation22_spill]] %s1734_s2 }
   0x3   :  { %1752 = sst [smem:[#allocation23_spill]] %s1737_s5 }
   0x4   :  { %1753 = sst [smem:[#allocation24_spill]] %s1739_s7 }
   0x5   :  { %12 = vsyncpa [#allocation4], 0 }
   0x6   :  { %14 = vsyncpa [#allocation4 + $0x1], 0 }
   0x7   :  { %15 = vsyncpa [#allocation7], 0 }
   0x8   :  { %17 = vsyncpa [#allocation7 + $0x1], 0 }
   0x9   :  { %18 = vsyncpa [#allocation5], 0 }
   0xa   :  { %20 = vsyncpa [#allocation5 + $0x1], 0  ;;  %s1406_s24 = smov 0   ;;  %s1408_s25 = smov 0  }
   0xb   :  { %s1410_s26 = smov 0   ;;  %s1412_s27 = smov 0  }
   0xc   :  { %s1414_s28 = smov 0   ;;  %s1416_s29 = smov 0  }
   0xd   :  { %s1418_s30 = smov 0   ;;  %s1420_s8 = smov 0  }
   0xe LB: > { %1754 = sst [smem:[#allocation13_spill]] %s1323_s24  ;;  %s1447_s9 = sadd.s32 4294967295, %s1351_s8   ;;  %s1351_s8 = sphi %s1420_s8, %s26_s8   ;;  %s1347_s30 = sphi %s1418_s30, %s1784_s30   ;;  %s1343_s29 = sphi %s1416_s29, %s1789_s29   ;;  %s1339_s28 = sphi %s1414_s28, %s1782_s28   ;;  %s1335_s27 = sphi %s1412_s27, %s1788_s27   ;;  %s1331_s26 = sphi %s1410_s26, %s1787_s26   ;;  %s1327_s25 = sphi %s1408_s25, %s1786_s25   ;;  %s1323_s24 = sphi %s1406_s24, %s1785_s24  }
   0xf   : > { %1755 = sst [smem:[#allocation14_spill]] %s1339_s28  ;;  %s922_s10 = sadd.s32 4294967294, %s1351_s8  }
  0x10   : > { %1756 = sst [smem:[#allocation15_spill]] %s1347_s30  ;;  %s35_s11 = sadd.s32 1, %s1343_s29 }
  0x11   : > { %s38_s12 = sadd.s32 1, %s1347_s30  ;;  %p36_p0 = scmp.ge.s32.totalorder %s35_s11, 2 }
  0x12   : > { %s47_s13 = sadd.s32 1, %s1331_s26  ;;  %p54_p1 = scmp.ne.s32.totalorder %s1331_s26, %s1327_s25 }
  0x13   : > { %p55_p2 = scmp.eq.s32.totalorder %s1351_s8, 0  ;;  %s1791_s11 = smov (%p36_p0, %s35_s11), 0 }
  0x14   : > { %1757 = sst [smem:[#allocation16_spill]] %s1791_s11  ;;  %s1793_s12 = smov (!%p36_p0, %s38_s12), %s1347_s30 }
  0x15   : > { %s43_s14 = ssub.s32 %s1343_s29, %s1791_s11  ;;  %p1461_p3 = por %p55_p2, %p54_p1 }
  0x16   : > { %p40_p4 = scmp.ge.s32.totalorder %s1793_s12, 2  ;;  %p60_p5 = scmp.ne.s32.totalorder %s1327_s25, %s1323_s24 }
  0x17   : > { %p61_p6 = scmp.eq.s32.totalorder %s1447_s9, 0  ;;  %p226_p7 = scmp.eq.s32.totalorder %s1447_s9, 3 }
  0x18   : > { %s1795_s12 = smov (%p40_p4, %s1793_s12), 0  ;;  %p232_p10 = scmp.eq.s32.totalorder %s922_s10, 3 }
  0x19   : > { %1759 = sst [smem:[#allocation17_spill]] %s1795_s12  ;;  %p1471_p8 = por %p61_p6, %p60_p5 }
  0x1a   : > { %p1475_p9 = por %p226_p7, %p54_p1  ;;  %s42_s18 = ssub.s32 %s1347_s30, %s1795_s12 }
  0x1b   : > { %s44_s19 = sor.u32 %s43_s14, %s42_s18  ;;  %p1481_p12 = por %p232_p10, %p60_p5 }
  0x1c   : > { %s1761_s17 = scalar_select %p1475_p9, 1, 0 }
  0x1d   : > { %p45_p11 = scmp.eq.s32.totalorder %s44_s19, 0  ;;  %p982_p13 = scmp.lt.s32.totalorder %s1351_s8, 4 }
  0x1e   : > { %1762 = sst [smem:[#allocation18_spill]] %s1761_s17  ;;  %s1744_s21 = sand.u32 1, %s1331_s26  }
  0x1f   : > { %s1763_s20 = scalar_select %p1481_p12, 1, 0 }
  0x20   : > { %s1488_s22 = scalar_select %p45_p11, %s1331_s26, %s47_s13  }
  0x21   : > { %1764 = sst [smem:[#allocation19_spill]] %s1763_s20  ;;  %s1492_s23 = sshll.u32 %s1744_s21, 4 }
  0x22   : > { %1765 = sst [smem:[#allocation20_spill]] %s1488_s22  ;;  %s926_s11 = sshll.u32 %s1347_s30, 2 }
  0x23   : > { %s272_s24 = sadd.s32 %s1343_s29, %s926_s11  ;;  %p1498_p0 = pnand %p982_p13, %p1461_p3 }
  0x24   : > { %s287_s14 = sand.u32 1, %s1351_s8   ;;  %s929_s18 = sshll.u32 %s1343_s29, 1 }
  0x25   : > { %s291_s19 = scalar_lea.vmem [#allocation6], %s1492_s23  ;;  %s296_s20 = sadd.s32 %s929_s18, %s926_s11 }
  0x26   : > { %s301_s12 = sshll.u32 %s291_s19, 4  ;;  %s931_s13 = sshll.u32 %s296_s20, 3  ;;  %s302_s12 = int_to_ptr.vmem [resolvable:$true] %s301_s12 }
  0x27   : > { %p936_p1 = scmp.ge.s32.totalorder %s1351_s8, 1  ;;  %s1767_s1 = sld [smem:[#allocation21_spill]] }
  0x28   : > { %s1768_s2 = sld [smem:[#allocation22_spill]]  ;;  %s288_s19 = scalar_lea.sflag [#allocation7], %s287_s14 }
  0x29   : > { %s1353_s11 = smov 128   ;;  %s1354_s18 = smov 8  }
  0x2a   : > { %p333_p2 = scmp.lt.s32.totalorder %s1351_s8, 5  ;;  %s927_s17 = sshll.u32 %s272_s24, 3 }
  0x2b   : > { %s268_s21 = scalar_lea.vmem [#allocation3], %s1492_s23  ;;  %s1770_s15 = sand.u32 1, %s1331_s26  }
  0x2c   : > { %p1515_p3 = pnand %p936_p1, %p333_p2 }
  0x2d   : > { %s298_s30 = scalar_lea.hbm %s1767_s1, %s931_s13  ;;  %s265_s1 = scalar_lea.sflag [#allocation4], %s1770_s15 }
  0x2e   : > { %s322_s7 = scalar_lea.hbm %s1768_s2, %s931_s13  ;;  %s299_s5 = sshll.u32 %s298_s30, 4  ;;  %s300_s5 = int_to_ptr.hbm [resolvable:$true] %s299_s5 }
  0x2f   : > { %s323_s28 = sshll.u32 %s322_s7, 4  ;;  %s277_s30 = sshll.u32 %s268_s21, 4  ;;  %s324_s28 = int_to_ptr.hbm [resolvable:$true] %s323_s28  ;;  %s278_s30 = int_to_ptr.vmem [resolvable:$true] %s277_s30 }
  0x30   : > { %974 = dma.hbm_to_vmem [thread:$0]  (!%p1498_p0), %s300_s5, 256, %s302_s12, %s288_s19, %s1353_s11, %s1353_s11, %s1354_s18  }
  0x31   : > { %s274_s13 = scalar_lea.hbm %s1732_s0, %s927_s17  ;;  %s1355_s2 = smov 256  }
  0x32   : > { %s275_s14 = sshll.u32 %s274_s13, 4  ;;  %s315_s5 = scalar_lea.vmem [#allocation8], %s1492_s23  ;;  %s276_s14 = int_to_ptr.hbm [resolvable:$true] %s275_s14 }
  0x33   : > { %971 = dma.hbm_to_vmem [thread:$0]  (!%p1498_p0), %s276_s14, 256, %s278_s30, %s265_s1, %s1355_s2, %s1353_s11, %s1354_s18  }
  0x34   : > { %s325_s12 = sshll.u32 %s315_s5, 4  ;;  %337 = sbr.rel (%p1515_p3) target bundleno = 756 (0x2f4), region = 48  ;;  %s326_s12 = int_to_ptr.vmem [resolvable:$true] %s325_s12 }
  0x35   : > { %977 = dma.hbm_to_vmem [thread:$0]  (!%p1498_p0), %s324_s28, 256, %s326_s12, %s288_s19, %s1353_s11, %s1353_s11, %s1354_s18  }
  0x36   : > { %s1533_s24 = sand.u32 (!%p1515_p3), 1, %s1327_s25  }
  0x37   : > { %s1536_s17 = sshll.u32 (!%p1515_p3), %s1533_s24, 4  ;;  %s340_s21 = scalar_lea.sflag (!%p1515_p3), [#allocation4], %s1533_s24 }
  0x38   : > { %s343_s7 = scalar_lea.vmem (!%p1515_p3), [#allocation3], %s1536_s17 }
  0x39   : > { %1310 = dma.done.wait (%p1471_p8), %s340_s21, 256  }
  0x3a   : > { %1312 = vsyncadd (%p1471_p8), %s340_s21, 4294967040  ;;  %s349_s1 = sand.u32 1, %s1447_s9   ;;  %s353_s28 = scalar_lea.vmem [#allocation6], %s1536_s17 }
  0x3b   : > { %s350_s2 = scalar_lea.sflag [#allocation7], %s349_s1 }
  0x3c   : > { %1314 = dma.done.wait (%p1471_p8), %s350_s2, 512  }
  0x3d   : > { %1316 = vsyncadd (%p1471_p8), %s350_s2, 4294966784  ;;  %v1550_v0 = vld [vmem:[%s343_s7 + $0x8] sm:$0xff]  ;;  %s363_s23 = scalar_lea.vmem [#allocation8], %s1536_s17  ;;  %v1561_v5 = vld [vmem:[%s353_s28] sm:$0xff]  ;;  %s1356_s9 = smov 126   ;;  %vm476_vm6 = vcmask 1031168  }
  0x3e   : > { %v1553_v1 = vld [vmem:[%s363_s23] sm:$0xff]  ;;  %v1555_v2 = vld [vmem:[%s363_s23 + $0x8] sm:$0xff]  ;;  %vm427_vm0 = vcmp.gt.f32.partialorder %v1550_v0, 0.0  ;;  %v433_v3 = vmul.f32 0.1, %v1550_v0  ;;  %vm423_vm3 = vcmp.gt.f32.partialorder %v1561_v5, 0.0 }
  0x3f   : > { %vm428_vm1 = vcmp.gt.f32.partialorder %v1555_v2, 0.0  ;;  %v434_v4 = vmul.f32 0.1, %v1555_v2  ;;  %v1563_v6 = vld [vmem:[%s353_s28 + $0x8] sm:$0xff]  ;;  %v1565_v7 = vld [vmem:[%s343_s7] sm:$0xff]  ;;  %vm425_vm2 = vcmp.gt.f32.partialorder %v1553_v1, 0.0 }
  0x40   : > { %v431_v8 = vmul.f32 0.1, %v1553_v1  ;;  %v1570_v9 = vsel %vm427_vm0, %v1550_v0, %v433_v3  ;;  %vm426_vm4 = vcmp.gt.f32.partialorder %v1563_v6, 0.0  ;;  %v429_v12 = vmul.f32 0.1, %v1561_v5  ;;  %s1357_s16 = smov 127  }
  0x41   : > { %v1573_v10 = vsel %vm428_vm1, %v1555_v2, %v434_v4  ;;  %v432_v13 = vmul.f32 0.1, %v1563_v6  ;;  %vm424_vm5 = vcmp.gt.f32.partialorder %v1565_v7, 0.0  ;;  %v430_v14 = vmul.f32 0.1, %v1565_v7  ;;  %s1358_s10 = smov 4  }
  0x42   : > { %v1061_v11 = vpack.i.bf16 %v1573_v10, %v1570_v9  ;;  %v435_v15 = vsel %vm423_vm3, %v1561_v5, %v429_v12  ;;  %v437_v19 = vsel %vm425_vm2, %v1553_v1, %v431_v8  ;;  %vm459_vm7 = vcmask 1039360   ;;  %s1359_s19 = smov 3   ;;  %v484_v55 = vld [vmem:[%s1736_s4 + $0x8] sm:$0xff]  ;;  %s945_s5 = sshll.u32 %s1335_s27, 7 }
  0x43   : > { %v438_v16 = vsel %vm426_vm4, %v1563_v6, %v432_v13  ;;  %v436_v18 = vsel %vm424_vm5, %v1565_v7, %v430_v14  ;;  %v1360_v56 = vmov 0   ;;  %vm531_vm8 = vcmask 31744   ;;  %s946_s12 = sadd.s32 4294967293, %s945_s5  ;;  %s1361_s21 = smov 122  }
  0x44   : > { %1062 = vrot.lane.b32.xlu0 %v1061_v11, %s1356_s9  ;;  %v1071_v17 = vpack.i.bf16 %v435_v15, %v438_v16  ;;  %v1081_v20 = vpack.i.bf16 %v437_v19, %v436_v18  ;;  %1137 = vset.pattern.permute.xlu2 %v1360_v56  ;;  %vm556_vm9 = vcmask 392192   ;;  %vm627_vm10 = vcmask 23552   ;;  %s1362_s2 = smov 125   ;;  %s1777_s15 = sld [smem:[#allocation24_spill]] }
  0x45   : > { %1136 = vset.pattern.permute.xlu0 %v1360_v56  ;;  %1158 = vset.pattern.permute.xlu1 %v1360_v56  ;;  %vm699_vm5 = vcmask 998400  }
  0x46   : > { %1072 = vrot.lane.b32.xlu1 %v1071_v17, %s1356_s9  ;;  %1082 = vrot.lane.b32.xlu2 %v1081_v20, %s1357_s16 }
  0x4c   : > { %1067 = vrot.lane.b32.xlu0 %v1081_v20, %s1356_s9  ;;  %s1775_s9 = sld [smem:[#allocation14_spill]] }
  0x4e   : > { %1077 = vrot.lane.b32.xlu1 %v1061_v11, %s1357_s16  ;;  %1087 = vrot.lane.b32.xlu2 %v1071_v17, %s1357_s16 }
  0x52   : > { %s950_s20 = sshll.u32 %s1775_s9, 2  ;;  %s1269_s9 = scalar_lea.hbm %s1777_s15, 64 }
  0x53   : > { %s778_s30 = sadd.s32 %s1335_s27, %s950_s20  ;;  %s768_s27 = scalar_lea.sflag [#allocation5], %s1533_s24 }
  0x54   : > { %s951_s22 = sshll.u32 %s778_s30, 3 }
  0x55   : > { %s780_s5 = scalar_lea.hbm %s1777_s15, %s951_s22 }
  0x56   : > { %s783_s1 = sshll.u32 %s780_s5, 4  ;;  %s784_s1 = int_to_ptr.hbm [resolvable:$true] %s783_s1 }
  0xa0   : > { %v1083_v24 = vpop.permute.xlu2 %1082 }
  0xa1   : > { %v1085_v40 = vunpack.i.h.bf16 %v1083_v24  ;;  %v1084_v41 = vunpack.i.l.bf16 %v1083_v24 }
  0xa3   : > { %v461_v48 = vsel %vm459_vm7, %v1084_v41, %v1085_v40 }
  0xa4   : > { %v1111_v51 = vpack.i.bf16 %v1085_v40, %v461_v48 }
  0xa8   : > { %v1088_v36 = vpop.permute.xlu2 %1087 }
  0xa9   : > { %v1089_v43 = vunpack.i.l.bf16 %v1088_v36  ;;  %v1090_v46 = vunpack.i.h.bf16 %v1088_v36  ;;  %v640_v36 = vlaneseq }
  0xab   : > { %v460_v50 = vsel %vm459_vm7, %v1090_v46, %v1084_v41  ;;  %v641_v40 = vand.u32 127, %v640_v36  ;;  %v645_v41 = vstv %s946_s12  ;;  %s404_s12 = scalar_lea.vmem [#allocation9], %s1536_s17 }
  0xac   : > { %v1121_v53 = vpack.i.bf16 %v460_v50, %v1573_v10 }
  0xb6   : > { %v1063_v21 = vpop.permute.xlu0 %1062 }
  0xb7   : > { %v1065_v22 = vunpack.i.h.bf16 %v1063_v21  ;;  %v1064_v23 = vunpack.i.l.bf16 %v1063_v21 }
  0xb8   : > { %v1073_v26 = vpop.permute.xlu1 %1072 }
  0xb9   : > { %v480_v25 = vsel %vm476_vm6, %v1064_v23, %v1065_v22  ;;  %v1075_v28 = vunpack.i.h.bf16 %v1073_v26  ;;  %v1074_v32 = vunpack.i.l.bf16 %v1073_v26 }
  0xba   : > { %v1091_v27 = vpack.i.bf16 %v1065_v22, %v480_v25 }
  0xbb   : > { %v479_v45 = vsel %vm476_vm6, %v1074_v32, %v1064_v23 }
  0xbc   : > { %1092 = vrot.lane.b32.xlu0 %v1091_v27, %s1358_s10 }
  0xbe   : > { %v1068_v29 = vpop.permute.xlu0 %1067 }
  0xbf   : > { %v1070_v30 = vunpack.i.h.bf16 %v1068_v29  ;;  %v1069_v31 = vunpack.i.l.bf16 %v1068_v29 }
  0xc0   : > { %v1078_v34 = vpop.permute.xlu1 %1077 }
  0xc1   : > { %v478_v33 = vsel %vm476_vm6, %v1069_v31, %v1070_v30  ;;  %v477_v35 = vsel %vm476_vm6, %v1075_v28, %v1069_v31  ;;  %v1080_v38 = vunpack.i.h.bf16 %v1078_v34  ;;  %v1079_v39 = vunpack.i.l.bf16 %v1078_v34 }
  0xc2   : > { %v1096_v37 = vpack.i.bf16 %v1070_v30, %v478_v33  ;;  %v481_v30 = vld [vmem:[%s1735_s3] sm:$0xff]  ;;  %v482_v33 = vld [vmem:[%s1735_s3 + $0x8] sm:$0xff]  ;;  %vm686_vm6 = vcmask 1022976  }
  0xc3   : > { %v1106_v42 = vpack.i.bf16 %v477_v35, %v1080_v38  ;;  %v463_v44 = vsel %vm459_vm7, %v1079_v39, %v1080_v38  ;;  %v462_v49 = vsel %vm459_vm7, %v1089_v43, %v1079_v39  ;;  %v646_v43 = vadd.s32 %v645_v41, %v641_v40 }
  0xc4   : > { %1097 = vrot.lane.b32.xlu1 %v1096_v37, %s1358_s10  ;;  %v1101_v47 = vpack.i.bf16 %v463_v44, %v479_v45  ;;  %v1116_v52 = vpack.i.bf16 %v1570_v9, %v462_v49 }
  0xc5   : > { %1107 = vrot.lane.b32.xlu0 %v1106_v42, %s1358_s10  ;;  %v642_v42 = vadd.s32 128, %v641_v40  ;;  %vm648_vm11 = vcmp.ge.s32.totalorder %v646_v43, 0  ;;  %vm650_vm12 = vcmp.lt.s32.totalorder %v646_v43, 256 }
  0xc6   : > { %1102 = vrot.lane.b32.xlu2 %v1101_v47, %s1358_s10  ;;  %vm1651_vm15 = vmand %vm648_vm11, %vm650_vm12 }
  0xc7   : > { %v647_v44 = vadd.s32 %v645_v41, %v642_v42 }
  0xc9   : > { %vm649_vm13 = vcmp.ge.s32.totalorder %v647_v44, 0  ;;  %vm651_vm14 = vcmp.lt.s32.totalorder %v647_v44, 256 }
  0xca   : > { %vm1655_vm0 = vmand %vm649_vm13, %vm651_vm14 }
  0xcc   : > { %1112 = vrot.lane.b32.xlu1 %v1111_v51, %s1358_s10 }
  0xcd   : > { %1122 = vrot.lane.b32.xlu0 %v1121_v53, %s1358_s10 }
  0xce   : > { %1117 = vrot.lane.b32.xlu2 %v1116_v52, %s1358_s10 }
  0xd4   : > { %1127 = vrot.lane.b32.xlu1 %v1081_v20, %s1358_s10 }
  0xd5   : > { %492 = vperm.xlu0 %1136, %v484_v55  }
  0xd6   : > { %1132 = vrot.lane.b32.xlu2 %v1071_v17, %s1358_s10 }
  0xdc   : > { %621 = vrot.lane.b32.xlu1 %v1563_v6, %s1359_s19 }
  0xdd   : > { %615 = vrot.lane.b32.xlu0 %v1561_v5, %s1359_s19 }
  0xde   : > { %623 = vrot.lane.b32.xlu2 %v1550_v0, %s1359_s19  ;;  %v483_v0 = vld [vmem:[%s1736_s4] sm:$0xff] }
  0xe4   : > { %625 = vrot.lane.b32.xlu1 %v1555_v2, %s1359_s19 }
  0xe6   : > { %487 = vperm.xlu2 %1137, %v483_v0  }
  0xec   : > { %617 = vrot.lane.b32.xlu1 %v1565_v7, %s1359_s19 }
  0xee   : > { %619 = vrot.lane.b32.xlu2 %v1553_v1, %s1359_s19  ;;  %s1776_s19 = sld [smem:[#allocation23_spill]] }
 0x120   : > { %v1103_v54 = vpop.permute.xlu2 %1102 }
 0x121   : > { %v1104_v58 = vunpack.i.l.bf16 %v1103_v54  ;;  %v1105_v11 = vunpack.i.h.bf16 %v1103_v54 }
 0x128   : > { %v1118_v63 = vpop.permute.xlu2 %1117 }
 0x129   : > { %v1119_v7 = vunpack.i.l.bf16 %v1118_v63  ;;  %v1120_v23 = vunpack.i.h.bf16 %v1118_v63 }
 0x12b   : > { %v538_v14 = vsel %vm531_vm8, %v1119_v7, %v1105_v11 }
 0x12e   : > { %v1093_v57 = vpop.permute.xlu0 %1092 }
 0x12f   : > { %v1095_v59 = vunpack.i.h.bf16 %v1093_v57  ;;  %v1094_v60 = vunpack.i.l.bf16 %v1093_v57 }
 0x130   : > { %v1133_v5 = vpop.permute.xlu2 %1132 }
 0x131   : > { %v542_v61 = vsel %vm531_vm8, %v1104_v58, %v1094_v60  ;;  %v543_v62 = vsel %vm531_vm8, %v1094_v60, %v1095_v59  ;;  %v1134_v19 = vunpack.i.l.bf16 %v1133_v5  ;;  %v1135_v25 = vunpack.i.h.bf16 %v1133_v5 }
 0x132   : > { %573 = vmatpush.msra.mxu0 %v542_v61  ;;  %954 = vmatpush.msra.mxu3 %v542_v61 }
 0x133   : > { %596 = vmatpush.msra.mxu1 %v543_v62  ;;  %v534_v26 = vsel %vm531_vm8, %v1134_v19, %v1120_v23 }
 0x136   : > { %v1098_v2 = vpop.permute.xlu1 %1097 }
 0x137   : > { %v1100_v3 = vunpack.i.h.bf16 %v1098_v2  ;;  %v1099_v4 = vunpack.i.l.bf16 %v1098_v2  ;;  %v1108_v6 = vpop.permute.xlu0 %1107 }
 0x138   : > { %v1110_v8 = vunpack.i.h.bf16 %v1108_v6  ;;  %v1109_v9 = vunpack.i.l.bf16 %v1108_v6  ;;  %v624_v35 = vpop.permute.xlu2 %623 }
 0x139   : > { %v541_v10 = vsel %vm531_vm8, %v1099_v4, %v1100_v3 }
 0x13a   : > { %597 = vmatpush.msra.mxu1 %v541_v10  ;;  %v540_v12 = vsel %vm531_vm8, %v1110_v8, %v1099_v4  ;;  %v539_v13 = vsel %vm531_vm8, %v1105_v11, %v1109_v9 }
 0x13b   : > { %574 = vmatpush.msra.mxu0 %v540_v12  ;;  %955 = vmatpush.msra.mxu3 %v540_v12 }
 0x13c   : > { %598 = vmatpush.msra.mxu1 %v539_v13 }
 0x13d   : > { %575 = vmatpush.msra.mxu0 %v538_v14  ;;  %956 = vmatpush.msra.mxu3 %v538_v14 }
 0x13e   : > { %v1113_v15 = vpop.permute.xlu1 %1112 }
 0x13f   : > { %v1115_v16 = vunpack.i.h.bf16 %v1113_v15  ;;  %v1114_v17 = vunpack.i.l.bf16 %v1113_v15  ;;  %v1123_v18 = vpop.permute.xlu0 %1122 }
 0x140   : > { %v1125_v20 = vunpack.i.h.bf16 %v1123_v18  ;;  %v1124_v21 = vunpack.i.l.bf16 %v1123_v18  ;;  %v488_v39 = vpop.permute.xlu2 %487  ;;  %v707_v18 = vld [vmem:[%s1738_s6 + $0x8] sm:$0xff] }
 0x141   : > { %v537_v22 = vsel %vm531_vm8, %v1114_v17, %v1115_v16 }
 0x142   : > { %599 = vmatpush.msra.mxu1 %v537_v22  ;;  %v536_v24 = vsel %vm531_vm8, %v1125_v20, %v1114_v17  ;;  %v535_v1 = vsel %vm531_vm8, %v1120_v23, %v1124_v21  ;;  %v706_v17 = vld [vmem:[%s1738_s6] sm:$0xff] }
 0x143   : > { %576 = vmatpush.msra.mxu0 %v536_v24  ;;  %957 = vmatpush.msra.mxu3 %v536_v24 }
 0x144   : > { %600 = vmatpush.msra.mxu1 %v535_v1 }
 0x145   : > { %577 = vmatpush.msra.mxu0 %v534_v26  ;;  %958 = vmatpush.msra.mxu3 %v534_v26 }
 0x146   : > { %v1128_v27 = vpop.permute.xlu1 %1127 }
 0x147   : > { %v1130_v28 = vunpack.i.h.bf16 %v1128_v27  ;;  %v1129_v29 = vunpack.i.l.bf16 %v1128_v27  ;;  %v493_v38 = vpop.permute.xlu0 %492 }
 0x148   : > { %v620_v47 = vpop.permute.xlu2 %619 }
 0x149   : > { %v532_v31 = vsel %vm531_vm8, %v1135_v25, %v1129_v29  ;;  %v533_v32 = vsel %vm531_vm8, %v1129_v29, %v1130_v28 }
 0x14a   : > { %578 = vmatpush.msra.mxu0 %v532_v31  ;;  %959 = vmatpush.msra.mxu3 %v532_v31 }
 0x14b   : > { %601 = vmatpush.msra.mxu1 %v533_v32  ;;  %941 = vmatmul.msk.f32.vlgmr.msra.gmra.mxu0 %vm556_vm9, %v481_v30 }
 0x14c   : > { %942 = vmatmul.msk.f32.vlgmr.msra.gmra.mxu3 %vm556_vm9, %v482_v33  ;;  %943 = vmatmul.msk.f32.vlgmr.msra.gmra.mxu1 %vm556_vm9, %v481_v30 }
 0x14e   : > { %v622_v34 = vpop.permute.xlu1 %621 }
 0x14f   : > { %v616_v46 = vpop.permute.xlu0 %615  ;;  %v630_v2 = vsel %vm627_vm10, %v622_v34, %v624_v35  ;;  %v704_v34 = vld [vmem:[%s1776_s19] sm:$0xff] }
 0x154   : > { %944 = vmatmul.msk.f32.gmra.mxu1 %vm556_vm9, %v482_v33 }
 0x156   : > { %v626_v37 = vpop.permute.xlu1 %625 }
 0x157   : > { %v631_v9 = vsel %vm627_vm10, %v624_v35, %v626_v37  ;;  %v705_v35 = vld [vmem:[%s1776_s19 + $0x8] sm:$0xff] }
 0x15e   : > { %v618_v45 = vpop.permute.xlu1 %617 }
 0x15f   : > { %v628_v49 = vsel %vm627_vm10, %v616_v46, %v618_v45  ;;  %v629_v52 = vsel %vm627_vm10, %v618_v45, %v620_v47 }
 0x1c8   : > { %v580_v48 = vpop.f32.mrf.mxu0 }
 0x1c9   : > { %v581_v50 = vadd.f32 %v580_v48, %v488_v39  ;;  %v603_v51 = vpop.f32.mrf.mxu1 }
 0x1ca   : > { %v604_v53 = vadd.f32 %v603_v51, %v488_v39 }
 0x1cb   : > { %v636_v55 = vadd.f32 %v628_v49, %v581_v50 }
 0x1cc   : > { %v637_v57 = vadd.f32 %v629_v52, %v604_v53 }
 0x1cd   : > { %v658_v58 = vsel %vm1651_vm15, %v636_v55, 0.0 }
 0x1ce   : > { %v666_v59 = vmul.f32 0.1, %v658_v58  ;;  %v659_v60 = vsel %vm1655_vm0, %v637_v57, 0.0  ;;  %vm662_vm1 = vcmp.gt.f32.partialorder %v658_v58, 0.0 }
 0x1cf   : > { %v667_v61 = vmul.f32 0.1, %v659_v60  ;;  %v583_v62 = vpop.f32.mrf.mxu3  ;;  %vm663_vm2 = vcmp.gt.f32.partialorder %v659_v60, 0.0 }
 0x1d0   : > { %v584_v63 = vadd.f32 %v583_v62, %v493_v38  ;;  %v670_v0 = vsel %vm662_vm1, %v658_v58, %v666_v59 }
 0x1d1   : > { %v606_v3 = vpop.f32.mrf.mxu1  ;;  %v671_v4 = vsel %vm663_vm2, %v659_v60, %v667_v61 }
 0x1d2   : > { %v638_v6 = vadd.f32 %v630_v2, %v584_v63  ;;  %v607_v7 = vadd.f32 %v606_v3, %v493_v38  ;;  %v1138_v8 = vpack.i.bf16 %v671_v4, %v670_v0 }
 0x1d4   : > { %v660_v10 = vsel %vm1651_vm15, %v638_v6, 0.0  ;;  %v639_v11 = vadd.f32 %v631_v9, %v607_v7  ;;  %1139 = vrot.lane.b32.xlu1 %v1138_v8, %s1361_s21 }
 0x1d5   : > { %v668_v12 = vmul.f32 0.1, %v660_v10  ;;  %vm664_vm3 = vcmp.gt.f32.partialorder %v660_v10, 0.0 }
 0x1d6   : > { %v661_v13 = vsel %vm1655_vm0, %v639_v11, 0.0 }
 0x1d7   : > { %v669_v14 = vmul.f32 0.1, %v661_v13  ;;  %vm665_vm4 = vcmp.gt.f32.partialorder %v661_v13, 0.0  ;;  %v672_v5 = vsel %vm664_vm3, %v660_v10, %v668_v12 }
 0x1d9   : > { %v673_v15 = vsel %vm665_vm4, %v661_v13, %v669_v14 }
 0x1da   : > { %v1148_v16 = vpack.i.bf16 %v673_v15, %v672_v5 }
 0x1dc   : > { %1149 = vrot.lane.b32.xlu2 %v1148_v16, %s1362_s2  ;;  %1144 = vrot.lane.b32.xlu0 %v1148_v16, %s1361_s21  ;;  %s781_s21 = sshll.u32 %s404_s12, 4  ;;  %s782_s21 = int_to_ptr.vmem [resolvable:$true] %s781_s21 }
 0x1dd   : > { %710 = vperm.xlu1 %1158, %v706_v17  }
 0x1e4   : > { %715 = vperm.xlu2 %1137, %v707_v18   ;;  %1154 = vrot.lane.b32.xlu0 %v1138_v8, %s1362_s2 }
 0x1e5   : > { %753 = vrot.lane.b32.xlu1 %v659_v60, %s1362_s2 }
 0x1ec   : > { %755 = vrot.lane.b32.xlu2 %v660_v10, %s1362_s2  ;;  %751 = vrot.lane.b32.xlu0 %v658_v58, %s1362_s2 }
 0x1f4   : > { %757 = vrot.lane.b32.xlu0 %v661_v13, %s1362_s2  ;;  %s1263_s2 = sshra.s32 %s784_s1, 4  ;;  %s1264_s2 = int_to_ptr.hbm [resolvable:$true] %s1263_s2 }
 0x1f5   : > { %s1265_s28 = scalar_lea.hbm %s1264_s2, 16  ;;  %p1270_p7 = scmp.lt.s32.totalorder %s1264_s2, %s1777_s15 }
 0x1f6   : > { %p1266_p4 = scmp.ne.s32.totalorder %s1264_s2, %s1265_s28  ;;  %p1271_p8 = scmp.lt.s32.totalorder %s1269_s9, %s1265_s28 }
 0x1f8   : > { %p1267_p5 = pnand %p1266_p4, %p1475_p9  ;;  %p1272_p10 = por %p1271_p8, %p1270_p7 }
 0x1fa   : > { %p1268_p6 = pneg %p1267_p5 }
 0x1fc   : > { %p1273_p11 = pnand %p1272_p10, %p1268_p6 }
 0x236   : > { %v1150_v20 = vpop.permute.xlu2 %1149 }
 0x237   : > { %v1152_v25 = vunpack.i.h.bf16 %v1150_v20  ;;  %v1151_v26 = vunpack.i.l.bf16 %v1150_v20 }
 0x239   : > { %v688_v29 = vsel %vm686_vm6, %v1151_v26, %v1152_v25 }
 0x23e   : > { %v716_v38 = vpop.permute.xlu2 %715 }
 0x246   : > { %v1140_v19 = vpop.permute.xlu1 %1139  ;;  %v756_v46 = vpop.permute.xlu2 %755 }
 0x247   : > { %v1142_v22 = vunpack.i.h.bf16 %v1140_v19  ;;  %v1141_v23 = vunpack.i.l.bf16 %v1140_v19 }
 0x249   : > { %v700_v28 = vsel %vm699_vm5, %v1141_v23, %v1142_v22 }
 0x24e   : > { %v1145_v21 = vpop.permute.xlu0 %1144 }
 0x24f   : > { %v1147_v24 = vunpack.i.h.bf16 %v1145_v21  ;;  %v1146_v1 = vunpack.i.l.bf16 %v1145_v21  ;;  %v711_v36 = vpop.permute.xlu1 %710 }
 0x251   : > { %v701_v27 = vsel %vm699_vm5, %v1146_v1, %v1147_v24 }
 0x252   : > { %734 = vmatpush.msra.mxu2 %v701_v27 }
 0x254   : > { %735 = vmatpush.msra.mxu2 %v700_v28 }
 0x256   : > { %v1155_v30 = vpop.permute.xlu0 %1154  ;;  %736 = vmatpush.msra.mxu2 %v688_v29 }
 0x257   : > { %v1157_v31 = vunpack.i.h.bf16 %v1155_v30  ;;  %v1156_v32 = vunpack.i.l.bf16 %v1155_v30  ;;  %v754_v40 = vpop.permute.xlu1 %753 }
 0x259   : > { %v687_v33 = vsel %vm686_vm6, %v1156_v32, %v1157_v31 }
 0x25a   : > { %737 = vmatpush.msra.mxu2 %v687_v33 }
 0x25c   : > { %738 = vmatpush.msra.mxu2 %v672_v5 }
 0x25e   : > { %739 = vmatpush.msra.mxu2 %v670_v0  ;;  %v752_v37 = vpop.permute.xlu0 %751 }
 0x25f   : > { %947 = vmatmul.msk.f32.vlgmr.msra.gmra.mxu2 %vm556_vm9, %v704_v34  ;;  %v759_v42 = vsel %vm686_vm6, %v752_v37, %v754_v40 }
 0x266   : > { %v758_v44 = vpop.permute.xlu0 %757 }
 0x267   : > { %948 = vmatmul.msk.f32.gmra.mxu2 %vm556_vm9, %v705_v35  ;;  %v760_v48 = vsel %vm686_vm6, %v756_v46, %v758_v44 }
 0x2e2   : > { %v741_v39 = vpop.f32.mrf.mxu2 }
 0x2e3   : > { %v742_v41 = vadd.f32 %v741_v39, %v711_v36 }
 0x2e5   : > { %v763_v43 = vadd.f32 %v759_v42, %v742_v41 }
 0x2e7   : > { %765 = vst [vmem:[%s404_s12] sm:$0xff] %v763_v43 }
 0x2ea   : > { %v744_v45 = vpop.f32.mrf.mxu2 }
 0x2eb   : > { %v745_v47 = vadd.f32 %v744_v45, %v716_v38 }
 0x2ed   : > { %v764_v49 = vadd.f32 %v760_v48, %v745_v47 }
 0x2ef   : > { %766 = vst [vmem:[%s404_s12 + $0x8] sm:$0xff] %v764_v49 }
 0x2f0   : > { %1276 = shalt.err (!%p1273_p11)
}
 0x2f1   : > { %s1363_s24 = smov 128   ;;  %s1364_s11 = smov 256  }
 0x2f2   : > { %s1365_s18 = smov 8  }
 0x2f3   : > { %966 = dma.vmem_to_hbm [thread:$0]  (%p1475_p9), %s782_s21, 256, %s784_s1, %s768_s27, %s1363_s24, %s1364_s11, %s1365_s18  }
 0x2f4 PF: > { %s1779_s20 = sld [smem:[#allocation13_spill]]  ;;  %p983_p13 = scmp.ge.s32.totalorder %s1351_s8, 2 }
 0x2f6   : > { %p979_p0 = pnand %p983_p13, %p1481_p12 }
 0x2f8   : > { %p980_p1 = pneg %p979_p0 }
 0x2fa   : > { %s798_s22 = sand.u32 1, %s1779_s20  }
 0x2fb   : > { %s799_s13 = scalar_lea.sflag [#allocation5], %s798_s22 }
 0x2fc   : > { %1318 = dma.done.wait (%p980_p1), %s799_s13, 256  }
 0x2fd   : > { %1320 = vsyncadd (%p980_p1), %s799_s13, 4294967040  ;;  %s26_s8 = sadd.s32 1, %s1351_s8   ;;  %s1781_s14 = sld [smem:[#allocation20_spill]] }
 0x2fe   : > { %p23_p2 = scmp.ge.s32.totalorder %s26_s8, 6   ;;  %s1782_s28 = sld [smem:[#allocation15_spill]] }
 0x2ff   : > { %s1783_s5 = sld [smem:[#allocation16_spill]]  ;;  %s1785_s24 = smov %s1327_s25 }
 0x300   : > { %s1784_s30 = sld [smem:[#allocation17_spill]]  ;;  %s1786_s25 = smov %s1331_s26 }
 0x301   : > { %s1788_s27 = smov %s1343_s29  ;;  %25 = sbr.rel (!%p23_p2) target bundleno = 14 (0xe), region = 117 }
 0x303   : > { %s1787_s26 = smov %s1781_s14 }
 0x305   : > { %s1789_s29 = smov %s1783_s5 }
 0x306   :  { %805 = vsyncpa [#allocation4], 1 }
 0x307   :  { %807 = vsyncpa [#allocation4 + $0x1], 1 }
 0x308   :  { %808 = vsyncpa [#allocation7], 1 }
 0x309   :  { %810 = vsyncpa [#allocation7 + $0x1], 1 }
 0x30a   :  { %811 = vsyncpa [#allocation5], 1 }
 0x30b   :  { %813 = vsyncpa [#allocation5 + $0x1], 1 }

</bundles_post_ra>
